<compile_context>
chip_gen: v7x
topology: tpu7x:2x2x1
jax: 0.10.0
libtpu: 0.0.40
codegen_flags: <defaults>
</compile_context>

<pallas_src>
import functools

import jax
import jax.numpy as jnp
from jax import lax
from jax.experimental import pallas as pl
from jax.experimental.pallas import tpu as pltpu


def rnn_kernel(tok_ref, whh_ref, wxh_ref, why_ref, bh_ref, by_ref,
               out_ref, hs_ref, *, seq_len, batch, vocab, hidden, out_dim):
    S, B, V, H, O = seq_len, batch, vocab, hidden, out_dim

    # ---- one-hot built in-kernel via iota compare (pure row selection;
    #      out-of-range ids give an all-zero row, same as jax.nn.one_hot). ----
    tok = tok_ref[...]                                             # (S*B, 1) i32, time-major
    onehot = (lax.broadcasted_iota(jnp.int32, (S * B, V), 1) == tok
              ).astype(jnp.float32)                                # (S*B, V)

    # ---- hoisted input projection for ALL timesteps, b_h folded in. ----
    u = jnp.dot(onehot, wxh_ref[...],
                preferred_element_type=jnp.float32) + bh_ref[...]  # (S*B, H)

    # ---- recurrence: only h @ W_hh + tanh per step, fully unrolled.
    #      h stays in vregs; hidden states are staged in VMEM for the batched
    #      readout below.  (For long S this Python unroll would become a
    #      lax.fori_loop / a sequential grid axis.) ----
    whh = whh_ref[...]
    h = jnp.zeros((B, H), jnp.float32)
    for t in range(S):
        u_t = u[t * B:(t + 1) * B, :]                              # (B, H) static slice
        h = jnp.tanh(jnp.dot(h, whh, preferred_element_type=jnp.float32) + u_t)
        hs_ref[pl.ds(t * B, B), :] = h

    # ---- hoisted readout: one matmul over all S*B hidden states. ----
    y = jnp.dot(hs_ref[...], why_ref[...],
                preferred_element_type=jnp.float32) + by_ref[...]  # (S*B, O) time-major

    # ---- emit batch-major, lane-dense logits: out[b, t*O:(t+1)*O] = y_t[b]. ----
    for t in range(S):
        out_ref[:, pl.ds(t * O, O)] = y[t * B:(t + 1) * B, :]


def simple_rnn_forward(tokens, W_hh, W_xh, W_hy, b_h, b_y, *, in_dim):
    """tokens: int32 [batch, seq].  Returns logits [batch, seq, out_dim]."""
    B, S = tokens.shape
    H = W_hh.shape[0]
    V = in_dim
    O = W_hy.shape[1]
    assert W_xh.shape == (V, H)

    # Time-major flat token ids, shape (S*B, 1): row t*B + b  <->  tokens[b, t].
    # (64 bytes of int32 -- negligible, unlike the old S*B*V f32 one-hot.)
    tok_tm = tokens.T.reshape(S * B, 1).astype(jnp.int32)

    kernel = functools.partial(
        rnn_kernel, seq_len=S, batch=B, vocab=V, hidden=H, out_dim=O)

    out_flat = pl.pallas_call(
        kernel,
        out_shape=jax.ShapeDtypeStruct((B, S * O), jnp.float32),
        scratch_shapes=[pltpu.VMEM((S * B, H), jnp.float32)],   # all hidden states
    )(tok_tm,
      W_hh.astype(jnp.float32), W_xh.astype(jnp.float32),
      W_hy.astype(jnp.float32),
      b_h.reshape(1, H).astype(jnp.float32),
      b_y.reshape(1, O).astype(jnp.float32))

    # Metadata-only reshape back to the PyTorch convention [batch, seq, out_dim].
    return out_flat.reshape(B, S, O)


def _reference_forward(tokens, W_hh, W_xh, W_hy, b_h, b_y, in_dim):
    x = jax.nn.one_hot(tokens.T, in_dim, dtype=jnp.float32)  # (S, B, V)
    S, B, _ = x.shape
    h = jnp.zeros((B, W_hh.shape[0]), jnp.float32)
    outs = []
    for t in range(S):
        h = jnp.tanh(h @ W_hh + x[t] @ W_xh + b_h)
        outs.append(h @ W_hy + b_y)
    return jnp.transpose(jnp.stack(outs, axis=0), (1, 0, 2))


if __name__ == "__main__":
    # Module hyperparameters (method='backprop', actv_fn='tanh')
    in_dim = 16      # vocab_size
    hidden_dim = 32
    out_dim = 16
    batch = 2
    seq = 8

    key = jax.random.PRNGKey(0)
    k_hh, k_xh, k_hy, k_tok = jax.random.split(key, 4)

    # W_hh = rand_ortho((H,H), sqrt(6/(H+H))): random orthogonal, scaled.
    a = jax.random.normal(k_hh, (hidden_dim, hidden_dim), jnp.float32)
    q, _ = jnp.linalg.qr(a)
    W_hh = q * jnp.sqrt(6.0 / (hidden_dim + hidden_dim))
    # W_xh, W_hy ~ Normal(0, 0.1); biases zero.
    W_xh = 0.1 * jax.random.normal(k_xh, (in_dim, hidden_dim), jnp.float32)
    W_hy = 0.1 * jax.random.normal(k_hy, (hidden_dim, out_dim), jnp.float32)
    b_h = jnp.zeros((hidden_dim,), jnp.float32)
    b_y = jnp.zeros((out_dim,), jnp.float32)

    # Input batch of token ids [batch, seq] (torch.long equivalent).
    tokens = jax.random.randint(k_tok, (batch, seq), 0, in_dim, dtype=jnp.int32)

    logits = simple_rnn_forward(tokens, W_hh, W_xh, W_hy, b_h, b_y,
                                in_dim=in_dim)
    logits = jax.block_until_ready(logits)

    ref = _reference_forward(tokens, W_hh, W_xh, W_hy, b_h, b_y, in_dim)
    assert logits.shape == (batch, seq, out_dim)
    assert jnp.allclose(logits, ref, atol=1e-5, rtol=1e-5)

    print("KERNEL_OK")
</pallas_src>

<mosaic_0001>
module attributes {stable_mosaic.version = 11 : i64} {
  func.func @rnn_kernel(%arg0: memref<16x1xi32, #tpu.memory_space<vmem>>, %arg1: memref<32x32xf32, #tpu.memory_space<vmem>>, %arg2: memref<16x32xf32, #tpu.memory_space<vmem>>, %arg3: memref<32x16xf32, #tpu.memory_space<vmem>>, %arg4: memref<1x32xf32, #tpu.memory_space<vmem>>, %arg5: memref<1x16xf32, #tpu.memory_space<vmem>>, %arg6: memref<2x128xf32, #tpu.memory_space<vmem>>, %arg7: memref<16x32xf32, #tpu.memory_space<vmem>>) attributes {dimension_semantics = [], scalar_prefetch = 0 : i64, scratch_operands = 1 : i64, tpu.core_type = #tpu.core_type<tc>} {
    %c0 = arith.constant 0 : index
    %c0_0 = arith.constant 0 : index
    %0 = vector.load %arg0[%c0, %c0_0] : memref<16x1xi32, #tpu.memory_space<vmem>>, vector<16x1xi32>
    %1 = tpu.iota {dimensions = array<i32: 1>} : vector<16x16xi32>
    %2 = vector.broadcast %0 : vector<16x1xi32> to vector<16x16xi32>
    %3 = arith.cmpi eq, %1, %2 : vector<16x16xi32>
    %4 = arith.extui %3 : vector<16x16xi1> to vector<16x16xi32>
    %5 = arith.sitofp %4 : vector<16x16xi32> to vector<16x16xf32>
    %c0_1 = arith.constant 0 : index
    %c0_2 = arith.constant 0 : index
    %6 = vector.load %arg2[%c0_1, %c0_2] : memref<16x32xf32, #tpu.memory_space<vmem>>, vector<16x32xf32>
    %cst = arith.constant dense<0.000000e+00> : vector<16x32xf32>
    %7 = tpu.matmul %5, %6, %cst {dimension_numbers = #tpu.dot_dimension_numbers<[1], [0], [0], [1], [0, 0, 1, 1], [], []>} : vector<16x16xf32>, vector<16x32xf32>, vector<16x32xf32> -> vector<16x32xf32>
    %c0_3 = arith.constant 0 : index
    %c0_4 = arith.constant 0 : index
    %8 = vector.load %arg4[%c0_3, %c0_4] : memref<1x32xf32, #tpu.memory_space<vmem>>, vector<1x32xf32>
    %9 = vector.broadcast %8 : vector<1x32xf32> to vector<16x32xf32>
    %10 = arith.addf %7, %9 : vector<16x32xf32>
    %c0_5 = arith.constant 0 : index
    %c0_6 = arith.constant 0 : index
    %11 = vector.load %arg1[%c0_5, %c0_6] : memref<32x32xf32, #tpu.memory_space<vmem>>, vector<32x32xf32>
    %cst_7 = arith.constant 0.000000e+00 : f32
    %12 = vector.broadcast %cst_7 : f32 to vector<2x32xf32>
    %13 = vector.extract_strided_slice %10 {offsets = [0, 0], sizes = [2, 32], strides = [1, 1]} : vector<16x32xf32> to vector<2x32xf32>
    %cst_8 = arith.constant dense<0.000000e+00> : vector<2x32xf32>
    %14 = tpu.matmul %12, %11, %cst_8 {dimension_numbers = #tpu.dot_dimension_numbers<[1], [0], [0], [1], [0, 0, 1, 1], [], []>} : vector<2x32xf32>, vector<32x32xf32>, vector<2x32xf32> -> vector<2x32xf32>
    %15 = arith.addf %14, %13 : vector<2x32xf32>
    %16 = math.tanh %15 : vector<2x32xf32>
    %c0_9 = arith.constant 0 : index
    %c0_10 = arith.constant 0 : index
    %17 = vector.load %arg7[%c0_9, %c0_10] : memref<16x32xf32, #tpu.memory_space<vmem>>, vector<2x32xf32>
    tpu.vector_store %arg7[%c0_9, %c0_10], %16 {strides = array<i32>} : memref<16x32xf32, #tpu.memory_space<vmem>>, vector<2x32xf32>,
    %18 = vector.extract_strided_slice %10 {offsets = [2, 0], sizes = [2, 32], strides = [1, 1]} : vector<16x32xf32> to vector<2x32xf32>
    %cst_11 = arith.constant dense<0.000000e+00> : vector<2x32xf32>
    %19 = tpu.matmul %16, %11, %cst_11 {dimension_numbers = #tpu.dot_dimension_numbers<[1], [0], [0], [1], [0, 0, 1, 1], [], []>} : vector<2x32xf32>, vector<32x32xf32>, vector<2x32xf32> -> vector<2x32xf32>
    %20 = arith.addf %19, %18 : vector<2x32xf32>
    %21 = math.tanh %20 : vector<2x32xf32>
    %c2 = arith.constant 2 : index
    %c0_12 = arith.constant 0 : index
    %22 = vector.load %arg7[%c2, %c0_12] : memref<16x32xf32, #tpu.memory_space<vmem>>, vector<2x32xf32>
    tpu.vector_store %arg7[%c2, %c0_12], %21 {strides = array<i32>} : memref<16x32xf32, #tpu.memory_space<vmem>>, vector<2x32xf32>,
    %23 = vector.extract_strided_slice %10 {offsets = [4, 0], sizes = [2, 32], strides = [1, 1]} : vector<16x32xf32> to vector<2x32xf32>
    %cst_13 = arith.constant dense<0.000000e+00> : vector<2x32xf32>
    %24 = tpu.matmul %21, %11, %cst_13 {dimension_numbers = #tpu.dot_dimension_numbers<[1], [0], [0], [1], [0, 0, 1, 1], [], []>} : vector<2x32xf32>, vector<32x32xf32>, vector<2x32xf32> -> vector<2x32xf32>
    %25 = arith.addf %24, %23 : vector<2x32xf32>
    %26 = math.tanh %25 : vector<2x32xf32>
    %c4 = arith.constant 4 : index
    %c0_14 = arith.constant 0 : index
    %27 = vector.load %arg7[%c4, %c0_14] : memref<16x32xf32, #tpu.memory_space<vmem>>, vector<2x32xf32>
    tpu.vector_store %arg7[%c4, %c0_14], %26 {strides = array<i32>} : memref<16x32xf32, #tpu.memory_space<vmem>>, vector<2x32xf32>,
    %28 = vector.extract_strided_slice %10 {offsets = [6, 0], sizes = [2, 32], strides = [1, 1]} : vector<16x32xf32> to vector<2x32xf32>
    %cst_15 = arith.constant dense<0.000000e+00> : vector<2x32xf32>
    %29 = tpu.matmul %26, %11, %cst_15 {dimension_numbers = #tpu.dot_dimension_numbers<[1], [0], [0], [1], [0, 0, 1, 1], [], []>} : vector<2x32xf32>, vector<32x32xf32>, vector<2x32xf32> -> vector<2x32xf32>
    %30 = arith.addf %29, %28 : vector<2x32xf32>
    %31 = math.tanh %30 : vector<2x32xf32>
    %c6 = arith.constant 6 : index
    %c0_16 = arith.constant 0 : index
    %32 = vector.load %arg7[%c6, %c0_16] : memref<16x32xf32, #tpu.memory_space<vmem>>, vector<2x32xf32>
    tpu.vector_store %arg7[%c6, %c0_16], %31 {strides = array<i32>} : memref<16x32xf32, #tpu.memory_space<vmem>>, vector<2x32xf32>,
    %33 = vector.extract_strided_slice %10 {offsets = [8, 0], sizes = [2, 32], strides = [1, 1]} : vector<16x32xf32> to vector<2x32xf32>
    %cst_17 = arith.constant dense<0.000000e+00> : vector<2x32xf32>
    %34 = tpu.matmul %31, %11, %cst_17 {dimension_numbers = #tpu.dot_dimension_numbers<[1], [0], [0], [1], [0, 0, 1, 1], [], []>} : vector<2x32xf32>, vector<32x32xf32>, vector<2x32xf32> -> vector<2x32xf32>
    %35 = arith.addf %34, %33 : vector<2x32xf32>
    %36 = math.tanh %35 : vector<2x32xf32>
    %c8 = arith.constant 8 : index
    %c0_18 = arith.constant 0 : index
    %37 = vector.load %arg7[%c8, %c0_18] : memref<16x32xf32, #tpu.memory_space<vmem>>, vector<2x32xf32>
    tpu.vector_store %arg7[%c8, %c0_18], %36 {strides = array<i32>} : memref<16x32xf32, #tpu.memory_space<vmem>>, vector<2x32xf32>,
    %38 = vector.extract_strided_slice %10 {offsets = [10, 0], sizes = [2, 32], strides = [1, 1]} : vector<16x32xf32> to vector<2x32xf32>
    %cst_19 = arith.constant dense<0.000000e+00> : vector<2x32xf32>
    %39 = tpu.matmul %36, %11, %cst_19 {dimension_numbers = #tpu.dot_dimension_numbers<[1], [0], [0], [1], [0, 0, 1, 1], [], []>} : vector<2x32xf32>, vector<32x32xf32>, vector<2x32xf32> -> vector<2x32xf32>
    %40 = arith.addf %39, %38 : vector<2x32xf32>
    %41 = math.tanh %40 : vector<2x32xf32>
    %c10 = arith.constant 10 : index
    %c0_20 = arith.constant 0 : index
    %42 = vector.load %arg7[%c10, %c0_20] : memref<16x32xf32, #tpu.memory_space<vmem>>, vector<2x32xf32>
    tpu.vector_store %arg7[%c10, %c0_20], %41 {strides = array<i32>} : memref<16x32xf32, #tpu.memory_space<vmem>>, vector<2x32xf32>,
    %43 = vector.extract_strided_slice %10 {offsets = [12, 0], sizes = [2, 32], strides = [1, 1]} : vector<16x32xf32> to vector<2x32xf32>
    %cst_21 = arith.constant dense<0.000000e+00> : vector<2x32xf32>
    %44 = tpu.matmul %41, %11, %cst_21 {dimension_numbers = #tpu.dot_dimension_numbers<[1], [0], [0], [1], [0, 0, 1, 1], [], []>} : vector<2x32xf32>, vector<32x32xf32>, vector<2x32xf32> -> vector<2x32xf32>
    %45 = arith.addf %44, %43 : vector<2x32xf32>
    %46 = math.tanh %45 : vector<2x32xf32>
    %c12 = arith.constant 12 : index
    %c0_22 = arith.constant 0 : index
    %47 = vector.load %arg7[%c12, %c0_22] : memref<16x32xf32, #tpu.memory_space<vmem>>, vector<2x32xf32>
    tpu.vector_store %arg7[%c12, %c0_22], %46 {strides = array<i32>} : memref<16x32xf32, #tpu.memory_space<vmem>>, vector<2x32xf32>,
    %48 = vector.extract_strided_slice %10 {offsets = [14, 0], sizes = [2, 32], strides = [1, 1]} : vector<16x32xf32> to vector<2x32xf32>
    %cst_23 = arith.constant dense<0.000000e+00> : vector<2x32xf32>
    %49 = tpu.matmul %46, %11, %cst_23 {dimension_numbers = #tpu.dot_dimension_numbers<[1], [0], [0], [1], [0, 0, 1, 1], [], []>} : vector<2x32xf32>, vector<32x32xf32>, vector<2x32xf32> -> vector<2x32xf32>
    %50 = arith.addf %49, %48 : vector<2x32xf32>
    %51 = math.tanh %50 : vector<2x32xf32>
    %c14 = arith.constant 14 : index
    %c0_24 = arith.constant 0 : index
    %52 = vector.load %arg7[%c14, %c0_24] : memref<16x32xf32, #tpu.memory_space<vmem>>, vector<2x32xf32>
    tpu.vector_store %arg7[%c14, %c0_24], %51 {strides = array<i32>} : memref<16x32xf32, #tpu.memory_space<vmem>>, vector<2x32xf32>,
    %c0_25 = arith.constant 0 : index
    %c0_26 = arith.constant 0 : index
    %53 = vector.load %arg7[%c0_25, %c0_26] : memref<16x32xf32, #tpu.memory_space<vmem>>, vector<16x32xf32>
    %c0_27 = arith.constant 0 : index
    %c0_28 = arith.constant 0 : index
    %54 = vector.load %arg3[%c0_27, %c0_28] : memref<32x16xf32, #tpu.memory_space<vmem>>, vector<32x16xf32>
    %cst_29 = arith.constant dense<0.000000e+00> : vector<16x16xf32>
    %55 = tpu.matmul %53, %54, %cst_29 {dimension_numbers = #tpu.dot_dimension_numbers<[1], [0], [0], [1], [0, 0, 1, 1], [], []>} : vector<16x32xf32>, vector<32x16xf32>, vector<16x16xf32> -> vector<16x16xf32>
    %c0_30 = arith.constant 0 : index
    %c0_31 = arith.constant 0 : index
    %56 = vector.load %arg5[%c0_30, %c0_31] : memref<1x16xf32, #tpu.memory_space<vmem>>, vector<1x16xf32>
    %57 = vector.broadcast %56 : vector<1x16xf32> to vector<16x16xf32>
    %58 = arith.addf %55, %57 : vector<16x16xf32>
    %59 = vector.extract_strided_slice %58 {offsets = [0, 0], sizes = [2, 16], strides = [1, 1]} : vector<16x16xf32> to vector<2x16xf32>
    %c0_32 = arith.constant 0 : index
    %c0_33 = arith.constant 0 : index
    %60 = vector.load %arg6[%c0_32, %c0_33] : memref<2x128xf32, #tpu.memory_space<vmem>>, vector<2x16xf32>
    tpu.vector_store %arg6[%c0_32, %c0_33], %59 {strides = array<i32>} : memref<2x128xf32, #tpu.memory_space<vmem>>, vector<2x16xf32>,
    %61 = vector.extract_strided_slice %58 {offsets = [2, 0], sizes = [2, 16], strides = [1, 1]} : vector<16x16xf32> to vector<2x16xf32>
    %c0_34 = arith.constant 0 : index
    %c16 = arith.constant 16 : index
    %62 = vector.load %arg6[%c0_34, %c16] : memref<2x128xf32, #tpu.memory_space<vmem>>, vector<2x16xf32>
    tpu.vector_store %arg6[%c0_34, %c16], %61 {strides = array<i32>} : memref<2x128xf32, #tpu.memory_space<vmem>>, vector<2x16xf32>,
    %63 = vector.extract_strided_slice %58 {offsets = [4, 0], sizes = [2, 16], strides = [1, 1]} : vector<16x16xf32> to vector<2x16xf32>
    %c0_35 = arith.constant 0 : index
    %c32 = arith.constant 32 : index
    %64 = vector.load %arg6[%c0_35, %c32] : memref<2x128xf32, #tpu.memory_space<vmem>>, vector<2x16xf32>
    tpu.vector_store %arg6[%c0_35, %c32], %63 {strides = array<i32>} : memref<2x128xf32, #tpu.memory_space<vmem>>, vector<2x16xf32>,
    %65 = vector.extract_strided_slice %58 {offsets = [6, 0], sizes = [2, 16], strides = [1, 1]} : vector<16x16xf32> to vector<2x16xf32>
    %c0_36 = arith.constant 0 : index
    %c48 = arith.constant 48 : index
    %66 = vector.load %arg6[%c0_36, %c48] : memref<2x128xf32, #tpu.memory_space<vmem>>, vector<2x16xf32>
    tpu.vector_store %arg6[%c0_36, %c48], %65 {strides = array<i32>} : memref<2x128xf32, #tpu.memory_space<vmem>>, vector<2x16xf32>,
    %67 = vector.extract_strided_slice %58 {offsets = [8, 0], sizes = [2, 16], strides = [1, 1]} : vector<16x16xf32> to vector<2x16xf32>
    %c0_37 = arith.constant 0 : index
    %c64 = arith.constant 64 : index
    %68 = vector.load %arg6[%c0_37, %c64] : memref<2x128xf32, #tpu.memory_space<vmem>>, vector<2x16xf32>
    tpu.vector_store %arg6[%c0_37, %c64], %67 {strides = array<i32>} : memref<2x128xf32, #tpu.memory_space<vmem>>, vector<2x16xf32>,
    %69 = vector.extract_strided_slice %58 {offsets = [10, 0], sizes = [2, 16], strides = [1, 1]} : vector<16x16xf32> to vector<2x16xf32>
    %c0_38 = arith.constant 0 : index
    %c80 = arith.constant 80 : index
    %70 = vector.load %arg6[%c0_38, %c80] : memref<2x128xf32, #tpu.memory_space<vmem>>, vector<2x16xf32>
    tpu.vector_store %arg6[%c0_38, %c80], %69 {strides = array<i32>} : memref<2x128xf32, #tpu.memory_space<vmem>>, vector<2x16xf32>,
    %71 = vector.extract_strided_slice %58 {offsets = [12, 0], sizes = [2, 16], strides = [1, 1]} : vector<16x16xf32> to vector<2x16xf32>
    %c0_39 = arith.constant 0 : index
    %c96 = arith.constant 96 : index
    %72 = vector.load %arg6[%c0_39, %c96] : memref<2x128xf32, #tpu.memory_space<vmem>>, vector<2x16xf32>
    tpu.vector_store %arg6[%c0_39, %c96], %71 {strides = array<i32>} : memref<2x128xf32, #tpu.memory_space<vmem>>, vector<2x16xf32>,
    %73 = vector.extract_strided_slice %58 {offsets = [14, 0], sizes = [2, 16], strides = [1, 1]} : vector<16x16xf32> to vector<2x16xf32>
    %c0_40 = arith.constant 0 : index
    %c112 = arith.constant 112 : index
    %74 = vector.load %arg6[%c0_40, %c112] : memref<2x128xf32, #tpu.memory_space<vmem>>, vector<2x16xf32>
    tpu.vector_store %arg6[%c0_40, %c112], %73 {strides = array<i32>} : memref<2x128xf32, #tpu.memory_space<vmem>>, vector<2x16xf32>,
    return
  }
}

</mosaic_0001>

<bundles_post_ra>
// kernel: tpu_custom_call.1
= control target key start
LH: loop header
LB: loop body
LE: loop exit
PB: predicated region body
PF: predicated region fallthrough
CT: control target
= control target key end

     0   :  { %v1182_v2 = vmov 0   ;;  %v1183_v6 = vmov 0.0|0.0   ;;  %s1361_s0 = inlined_call_operand.vmem [shape: s32[16,1], index: 0, kind: input, shape index: {}]   ;;  %s1362_s1 = inlined_call_operand.vmem [shape: f32[32,32], index: 1, kind: input, shape index: {}]   ;;  %s1363_s2 = inlined_call_operand.vmem [shape: f32[16,32], index: 2, kind: input, shape index: {}]   ;;  %s1364_s3 = inlined_call_operand.vmem [shape: f32[32,16], index: 3, kind: input, shape index: {}]   ;;  %s1365_s4 = inlined_call_operand.vmem [shape: f32[1,32], index: 4, kind: input, shape index: {}]   ;;  %s1366_s5 = inlined_call_operand.vmem [shape: f32[1,16], index: 5, kind: input, shape index: {}]   ;;  %s1367_s6 = inlined_call_operand.hbm [shape: f32[2,128], index: 6, kind: output, shape index: {}]  }
   0x1   :  { %v24_v0 = vld [vmem:[%s1361_s0] sm:$0xff]  ;;  %1141 = vset.pattern.permute.xlu0 %v1182_v2  ;;  %v132_v3 = vld [vmem:[%s1362_s1 + $0x8] sm:$0xff]  ;;  %1073 = vmatprep.subr.bf16.mxu1 %v1183_v6 }
   0x2   :  { %v131_v1 = vld [vmem:[%s1362_s1] sm:$0xff]  ;;  %v41_v5 = vld [vmem:[%s1363_s2 + $0x8] sm:$0xff]  ;;  %29 = vperm.xlu0 %1141, %v24_v0  }
   0x3   :  { %v40_v4 = vld [vmem:[%s1363_s2] sm:$0xff]  ;;  %v1245_v7 = vpack.c.bf16 %v132_v3, %v131_v1 }
   0x4   :  { %v1069_v8 = vpack.c.bf16 %v41_v5, %v40_v4 }
   0x5   :  { %11 = vsyncpa [#allocation4], 0  ;;  %v25_v9 = vld [vmem:[%s1361_s0 + $0x8] sm:$0xff]  ;;  %1075 = vmatpush3.bf16.msra.mxu1 %v1245_v7  ;;  %v133_v10 = vld [vmem:[%s1362_s1 + $0x10] sm:$0xff]  ;;  %vm1184_vm0 = vmmov 0   ;;  %v1185_v13 = vmov 0.0   ;;  %v26_v14 = vlaneseq }
   0x6   :  { %1070 = vmatprep.subr.bf16.mxu0 %v1069_v8  ;;  %v134_v11 = vld [vmem:[%s1362_s1 + $0x18] sm:$0xff]  ;;  %1076 = vmatprep.subr.bf16.mxu1 %v1183_v6  ;;  %vm49_vm1 = vcmask 130048   ;;  %v900_v22 = vld [vmem:[%s1365_s4] ss:$0 sm:$0xff]  ;;  %vm210_vm4 = vcmask 254976   ;;  %vm135_vm5 = vcmask 261120  }
   0x7   :  { %1072 = vmatpush3.bf16.msra.mxu0 %v1069_v8  ;;  %v1258_v12 = vpack.c.bf16 %v134_v11, %v133_v10  ;;  %32 = vperm.xlu0 %1141, %v25_v9   ;;  %v27_v15 = vand.u32 127, %v26_v14  ;;  %v753_v59 = vld [vmem:[%s1364_s3] sm:$0xff]  ;;  %v754_v60 = vld [vmem:[%s1364_s3 + $0x8] sm:$0xff]  ;;  %v755_v62 = vld [vmem:[%s1364_s3 + $0x10] sm:$0xff]  ;;  %vm845_vm6 = vcmask 123904   ;;  %s1187_s21 = smov 64  }
   0x8   :  { %1079 = vmatprep.subr.bf16.mxu0 %v1183_v6  ;;  %978 = vmatprep.mubr.msk.f32.mxu1 %vm1184_vm0, %v1185_v13  ;;  %v1121_v61 = vpack.c.bf16 %v754_v60, %v753_v59  ;;  %v756_v63 = vld [vmem:[%s1364_s3 + $0x18] sm:$0xff]  ;;  %s1186_s3 = smov 80   ;;  %s1188_s22 = smov 48   ;;  %vm851_vm7 = vcmask 257154   ;;  %vm856_vm8 = vcmask 390404   ;;  %vm861_vm9 = vcmask 523654  }
   0x9   :  { %1078 = vmatpush3.bf16.msra.mxu1 %v1258_v12  ;;  %v1125_v0 = vpack.c.bf16 %v756_v63, %v755_v62  ;;  %s1189_s23 = smov 16   ;;  %s1190_s24 = smov 112   ;;  %vm867_vm10 = vcmask 648704   ;;  %vm872_vm11 = vcmask 781954   ;;  %vm877_vm12 = vcmask 915204  }
   0xa   :  { %1085 = vmatprep.subr.bf16.mxu1 %v1183_v6  ;;  %s1191_s25 = smov 32   ;;  %s1192_s26 = smov 96   ;;  %vm882_vm13 = vcmask 1048454  }
   0xc   :  { %979 = vmatmul.mubr.f32.vlgmr.msra.gmra.mrb[0].mxu1 %v1185_v13 }
   0xd   :  { %1087 = vmatpush3.bf16.msra.mxu1 %v1245_v7  ;;  %1000 = vmatprep.mubr.msk.f32.mxu1 %vm1184_vm0, %v1185_v13 }
   0xe   :  { %1088 = vmatprep.subr.bf16.mxu1 %v1183_v6 }
  0x11   :  { %1090 = vmatpush3.bf16.msra.mxu1 %v1258_v12 }
  0x12   :  { %1097 = vmatprep.subr.bf16.mxu1 %v1183_v6 }
  0x81   :  { %v30_v16 = vpop.permute.xlu0 %29 }
  0x82   :  { %vm34_vm2 = vcmp.eq.s32.totalorder %v27_v15, %v30_v16 }
  0x83   :  { %v898_v17 = vsel %vm34_vm2, 1.0, %v1185_v13 }
  0x84   :  { %967 = vmatprep.mubr.msk.f32.mxu0 %vm49_vm1, %v898_v17 }
  0x86   :  { %v33_v18 = vpop.permute.xlu0 %32 }
  0x87   :  { %vm35_vm3 = vcmp.eq.s32.totalorder %v27_v15, %v33_v18 }
  0x88   :  { %v899_v19 = vsel %vm35_vm3, 1.0, %v1185_v13 }
  0x89   :  { %968 = vmatmul.mubr.msk.f32.vlgmr.msra.gmra.mrb[0].mxu0 %vm49_vm1, %v899_v19 }
  0x8a   :  { %1081 = vmatpush3.bf16.msra.mxu0 %v1245_v7  ;;  %989 = vmatprep.mubr.msk.f32.mxu0 %vm1184_vm0, %v1185_v13 }
  0x8b   :  { %1082 = vmatprep.subr.bf16.mxu0 %v1183_v6 }
  0x8e   :  { %1084 = vmatpush3.bf16.msra.mxu0 %v1258_v12 }
  0x8f   :  { %1091 = vmatprep.subr.bf16.mxu0 %v1183_v6 }
  0xdf   :  { %v205_v20 = vpop.f32.mrb[0].mxu1 }
  0xe0   :  { %v980_v21 = vpop.f32.mrb[1].mxu1 }
 0x15c   :  { %v969_v23 = vpop.f32.mrb[0].mxu0 }
 0x15d   :  { %v1283_v24 = vadd.f32 %v969_v23, %v900_v22  ;;  %v122_v25 = vpop.f32.mrb[1].mxu0 }
 0x15e   :  { %v123_v26 = vadd.f32 %v900_v22, %v122_v25 }
 0x15f   :  { %v520_v48 = vrot.slane %v1283_v24, 2  ;;  %v597_v54 = vrot.slane %v1283_v24, 4  ;;  %v674_v1 = vrot.slane %v1283_v24, 6 }
 0x160   :  { %v206_v27 = vadd.f32 %v205_v20, %v123_v26  ;;  %v213_v29 = vrot.slane %v123_v26, 2  ;;  %v290_v34 = vrot.slane %v123_v26, 4  ;;  %v367_v39 = vrot.slane %v123_v26, 6 }
 0x162   :  { %1142 = vtanh.f32 %v206_v27 }
 0x16c   :  { %v1143_v28 = vpop.eup %1142 }
 0x16d   :  { %211 = vst.msk [vmem:[#allocation2] sm:$0x3] %vm210_vm4, %v1143_v28  ;;  %990 = vmatmul.mubr.msk.f32.vlgmr.msra.gmra.mrb[2].mxu0 %vm135_vm5, %v1143_v28 }
 0x16e   :  { %1093 = vmatpush3.bf16.msra.mxu0 %v1245_v7  ;;  %1011 = vmatprep.mubr.msk.f32.mxu0 %vm1184_vm0, %v1185_v13 }
 0x16f   :  { %1094 = vmatprep.subr.bf16.mxu0 %v1183_v6 }
 0x172   :  { %1096 = vmatpush3.bf16.msra.mxu0 %v1258_v12 }
 0x173   :  { %1103 = vmatprep.subr.bf16.mxu0 %v1183_v6 }
 0x240   :  { %v284_v30 = vpop.f32.mrb[2].mxu0 }
 0x241   :  { %v285_v31 = vadd.f32 %v284_v30, %v213_v29  ;;  %v991_v32 = vpop.f32.mrb[3].mxu0 }
 0x243   :  { %1144 = vtanh.f32 %v285_v31 }
 0x24d   :  { %v1145_v33 = vpop.eup %1144 }
 0x24e   :  { %289 = vst.msk [vmem:[#allocation2 + $0x2] sm:$0x3] %vm210_vm4, %v1145_v33  ;;  %1001 = vmatmul.mubr.msk.f32.vlgmr.msra.gmra.mrb[2].mxu1 %vm135_vm5, %v1145_v33 }
 0x24f   :  { %1099 = vmatpush3.bf16.msra.mxu1 %v1245_v7  ;;  %1022 = vmatprep.mubr.msk.f32.mxu1 %vm1184_vm0, %v1185_v13 }
 0x250   :  { %1100 = vmatprep.subr.bf16.mxu1 %v1183_v6 }
 0x253   :  { %1102 = vmatpush3.bf16.msra.mxu1 %v1258_v12 }
 0x254   :  { %1109 = vmatprep.subr.bf16.mxu1 %v1183_v6 }
 0x321   :  { %v361_v35 = vpop.f32.mrb[2].mxu1 }
 0x322   :  { %v362_v36 = vadd.f32 %v361_v35, %v290_v34  ;;  %v1002_v37 = vpop.f32.mrb[3].mxu1 }
 0x324   :  { %1146 = vtanh.f32 %v362_v36 }
 0x32e   :  { %v1147_v38 = vpop.eup %1146 }
 0x32f   :  { %366 = vst.msk [vmem:[#allocation2 + $0x4] sm:$0x3] %vm210_vm4, %v1147_v38  ;;  %1012 = vmatmul.mubr.msk.f32.vlgmr.msra.gmra.mrb[4].mxu0 %vm135_vm5, %v1147_v38 }
 0x330   :  { %1105 = vmatpush3.bf16.msra.mxu0 %v1245_v7  ;;  %1033 = vmatprep.mubr.msk.f32.mxu0 %vm1184_vm0, %v1185_v13 }
 0x331   :  { %1106 = vmatprep.subr.bf16.mxu0 %v1183_v6 }
 0x334   :  { %1108 = vmatpush3.bf16.msra.mxu0 %v1258_v12 }
 0x335   :  { %1115 = vmatprep.subr.bf16.mxu0 %v1183_v6 }
 0x402   :  { %v438_v40 = vpop.f32.mrb[4].mxu0 }
 0x403   :  { %v439_v41 = vadd.f32 %v438_v40, %v367_v39  ;;  %v1013_v42 = vpop.f32.mrb[5].mxu0 }
 0x405   :  { %1148 = vtanh.f32 %v439_v41 }
 0x40f   :  { %v1149_v43 = vpop.eup %1148 }
 0x410   :  { %443 = vst.msk [vmem:[#allocation2 + $0x6] sm:$0x3] %vm210_vm4, %v1149_v43  ;;  %1023 = vmatmul.mubr.msk.f32.vlgmr.msra.gmra.mrb[4].mxu1 %vm135_vm5, %v1149_v43 }
 0x411   :  { %1111 = vmatpush3.bf16.msra.mxu1 %v1245_v7  ;;  %1044 = vmatprep.mubr.msk.f32.mxu1 %vm1184_vm0, %v1185_v13 }
 0x412   :  { %1112 = vmatprep.subr.bf16.mxu1 %v1183_v6 }
 0x415   :  { %1114 = vmatpush3.bf16.msra.mxu1 %v1258_v12 }
 0x416   :  { %1122 = vmatprep.subr.bf16.mxu1 %v1121_v61 }
 0x417   :  { %v751_v53 = vld [vmem:[#allocation2] sm:$0xff] }
 0x4e3   :  { %v513_v44 = vpop.f32.mrb[4].mxu1 }
 0x4e4   :  { %v514_v45 = vadd.f32 %v513_v44, %v1283_v24  ;;  %v1024_v46 = vpop.f32.mrb[5].mxu1 }
 0x4e6   :  { %1150 = vtanh.f32 %v514_v45 }
 0x4f0   :  { %v1151_v47 = vpop.eup %1150 }
 0x4f1   :  { %518 = vst.msk [vmem:[#allocation2 + $0x8] sm:$0x3] %vm210_vm4, %v1151_v47  ;;  %1034 = vmatmul.mubr.msk.f32.vlgmr.msra.gmra.mrb[6].mxu0 %vm135_vm5, %v1151_v47 }
 0x4f2   :  { %1117 = vmatpush3.bf16.msra.mxu0 %v1245_v7  ;;  %1055 = vmatprep.mubr.msk.f32.mxu0 %vm1184_vm0, %v1185_v13  ;;  %v910_v7 = vld [vmem:[%s1366_s5] ss:$0 sm:$0xff]  ;;  %s1193_s5 = smov [#allocation3]  }
 0x4f3   :  { %1118 = vmatprep.subr.bf16.mxu0 %v1183_v6  ;;  %s890_s27 = sshll.u32 %s1193_s5, 4  ;;  %s891_s27 = int_to_ptr.vmem [resolvable:$true] %s890_s27 }
 0x4f4   :  { %s1158_s28 = scalar_lea.vmem %s891_s27, 32  ;;  %p1163_p1 = scmp.lt.s32.totalorder %s891_s27, %s891_s27 }
 0x4f5   :  { %p1159_p0 = scmp.ne.s32.totalorder %s891_s27, %s1158_s28  ;;  %p1164_p2 = scmp.lt.s32.totalorder %s1158_s28, %s1158_s28 }
 0x4f6   :  { %1120 = vmatpush3.bf16.msra.mxu0 %v1258_v12 }
 0x4f7   :  { %p1165_p3 = por %p1164_p2, %p1163_p1 }
 0x4f9   :  { %p1166_p4 = pnand %p1165_p3, %p1159_p0 }
 0x5c4   :  { %v591_v49 = vpop.f32.mrb[6].mxu0 }
 0x5c5   :  { %v592_v50 = vadd.f32 %v591_v49, %v520_v48  ;;  %v1035_v51 = vpop.f32.mrb[7].mxu0 }
 0x5c7   :  { %1152 = vtanh.f32 %v592_v50 }
 0x5d1   :  { %v1153_v52 = vpop.eup %1152 }
 0x5d2   :  { %596 = vst.msk [vmem:[#allocation2 + $0xa] sm:$0x3] %vm210_vm4, %v1153_v52  ;;  %1045 = vmatmul.mubr.msk.f32.vlgmr.msra.gmra.mrb[6].mxu1 %vm135_vm5, %v1153_v52 }
 0x5d3   :  { %1066 = vmatprep.mubr.msk.f32.mxu1 %vm135_vm5, %v751_v53  ;;  %1124 = vmatpush3.bf16.msra.mxu1 %v1121_v61 }
 0x5d4   :  { %1126 = vmatprep.subr.bf16.mxu1 %v1125_v0 }
 0x5d7   :  { %1128 = vmatpush3.bf16.msra.mxu1 %v1125_v0 }
 0x6a5   :  { %v668_v55 = vpop.f32.mrb[6].mxu1 }
 0x6a6   :  { %v669_v56 = vadd.f32 %v668_v55, %v597_v54  ;;  %v1046_v57 = vpop.f32.mrb[7].mxu1 }
 0x6a8   :  { %1154 = vtanh.f32 %v669_v56 }
 0x6b2   :  { %v1155_v58 = vpop.eup %1154 }
 0x6b3   :  { %673 = vst.msk [vmem:[#allocation2 + $0xc] sm:$0x3] %vm210_vm4, %v1155_v58  ;;  %1056 = vmatmul.mubr.msk.f32.vlgmr.msra.gmra.mrb[8].mxu0 %vm135_vm5, %v1155_v58 }
 0x786   :  { %v745_v2 = vpop.f32.mrb[8].mxu0 }
 0x787   :  { %v746_v3 = vadd.f32 %v745_v2, %v674_v1  ;;  %v1057_v4 = vpop.f32.mrb[9].mxu0 }
 0x789   :  { %1156 = vtanh.f32 %v746_v3 }
 0x793   :  { %v1157_v5 = vpop.eup %1156 }
 0x794   :  { %750 = vst.msk [vmem:[#allocation2 + $0xe] sm:$0x3] %vm210_vm4, %v1157_v5 }
 0x79b   :  { %v752_v6 = vld [vmem:[#allocation2 + $0x8] sm:$0xff] }
 0x79c   :  { %1067 = vmatmul.mubr.msk.f32.vlgmr.msra.gmra.mrb[8].mxu1 %vm135_vm5, %v752_v6 }
 0x86f   :  { %v1068_v8 = vpop.f32.mrb[8].mxu1 }
 0x870   :  { %v842_v9 = vadd.f32 %v1068_v8, %v910_v7  ;;  %v836_v10 = vpop.f32.mrb[9].mxu1 }
 0x871   :  { %v837_v11 = vadd.f32 %v910_v7, %v836_v10 }
 0x872   :  { %869 = vrot.lane.b32.xlu0 %v842_v9, %s1186_s3  ;;  %864 = vrot.lane.b32.xlu1 %v842_v9, %s1187_s21 }
 0x873   :  { %846 = vst.msk [vmem:[#allocation3] sm:$0x3] %vm845_vm6, %v837_v11 }
 0x876   :  { %858 = vrot.lane.b32.xlu0 %v837_v11, %s1188_s22  ;;  %848 = vrot.lane.b32.xlu1 %v837_v11, %s1189_s23 }
 0x87a   :  { %879 = vrot.lane.b32.xlu0 %v842_v9, %s1190_s24  ;;  %853 = vrot.lane.b32.xlu1 %v837_v11, %s1191_s25 }
 0x87e   :  { %874 = vrot.lane.b32.xlu1 %v842_v9, %s1192_s26 }
 0x8e4   :  { %v865_v12 = vpop.permute.xlu1 %864  ;;  %v870_v13 = vpop.permute.xlu0 %869 }
 0x8e8   :  { %v849_v14 = vpop.permute.xlu1 %848  ;;  %v859_v15 = vpop.permute.xlu0 %858 }
 0x8e9   :  { %852 = vst.msk [vmem:[#allocation3 - $0x2] sm:$0xc] %vm851_vm7, %v849_v14 }
 0x8ec   :  { %v854_v16 = vpop.permute.xlu1 %853  ;;  %v880_v18 = vpop.permute.xlu0 %879 }
 0x8ed   :  { %857 = vst.msk [vmem:[#allocation3 - $0x4] sm:$0x30] %vm856_vm8, %v854_v16 }
 0x8ee   :  { %862 = vst.msk [vmem:[#allocation3 - $0x6] sm:$0xc0] %vm861_vm9, %v859_v15 }
 0x8ef   :  { %868 = vst.msk [vmem:[#allocation3] sm:$0x3] %vm867_vm10, %v865_v12 }
 0x8f0   :  { %v875_v17 = vpop.permute.xlu1 %874  ;;  %873 = vst.msk [vmem:[#allocation3 - $0x2] sm:$0xc] %vm872_vm11, %v870_v13 }
 0x8f1   :  { %878 = vst.msk [vmem:[#allocation3 - $0x4] sm:$0x30] %vm877_vm12, %v875_v17 }
 0x8f2   :  { %883 = vst.msk [vmem:[#allocation3 - $0x6] sm:$0xc0] %vm882_vm13, %v880_v18 }
 0x8f3   :  { %1169 = shalt.err (!%p1166_p4)
}
 0x8f4   :  { %s1170_s7 = scalar_lea.hbm %s1367_s6, 32 }
 0x8f5   :  { %p1171_p5 = scmp.ne.s32.totalorder %s1367_s6, %s1170_s7  ;;  %p1174_p6 = scmp.lt.u32.totalorder %s1170_s7, %s1367_s6 }
 0x8f7   :  { %p1176_p7 = pnand %p1174_p6, %p1171_p5 }
 0x8f9   :  { %1179 = shalt.err (!%p1176_p7)
}
 0x8fa   :  { %893 = dma.vmem_to_hbm [thread:$0]  %s891_s27, 32, %s1367_s6, [#allocation4]  }
 0x8fb   :  { %1180 = dma.done.wait [#allocation4], 32  }
 0x8fc   :  { %1181 = vsyncadd [#allocation4], 4294967264 }
 0x8fd   :  { %897 = vsyncpa [#allocation4], 1 }

</bundles_post_ra>
